<compile_context>
chip_gen: v6e
topology: v6e:2x2x1
jax: 0.10.0
libtpu: 0.0.40
codegen_flags: <defaults>
</compile_context>

<pallas_src>
import functools

import jax
import jax.numpy as jnp
from jax.experimental import pallas as pl
from jax.experimental.pallas import tpu as pltpu


# ----------------------------- helpers ------------------------------------

def _round_up(n, m):
    return ((n + m - 1) // m) * m


def _pick_col_tile(total, target=1024):
    # Largest lane-dense tile <= target (at least 128, covers small demos).
    return min(target, _round_up(total, 128))


# ----------------------------- kernels ------------------------------------

def _nconv_chain_kernel(a_ref, x_ref, *out_refs):
    """One column tile: y1 = A@x, y2 = A@y1, ... (`order` powers, in-VMEM chain).

    a_ref:    (V_pad, V_pad) bf16 adjacency (resident, constant index_map)
    x_ref:    (V_pad, TN)    bf16 column tile of x in (V, N*C*L) layout
    out_refs: `order` refs, each (V_pad, TN) bf16
    """
    a = a_ref[...]
    cur = x_ref[...]
    for o_ref in out_refs:
        y = jnp.dot(a, cur, preferred_element_type=jnp.float32)  # MXU, f32 acc
        o_ref[...] = y.astype(o_ref.dtype)
        cur = y.astype(jnp.bfloat16)


def _make_conv1x1_acc_kernel(num_terms):
    def kernel(*refs):
        w_ref, b_ref = refs[0], refs[1]            # (K, Co, C8) bf16, (Co, 1) f32
        h_refs = refs[2:2 + num_terms]             # K x (C8, TN) bf16
        o_ref = refs[2 + num_terms]                # (Co, TN) f32
        # Bias folded into the accumulator init (no separate epilogue add).
        acc = jnp.broadcast_to(b_ref[...], o_ref.shape)
        for k, h_ref in enumerate(h_refs):
            acc = acc + jnp.dot(w_ref[k], h_ref[...],
                                preferred_element_type=jnp.float32)
        o_ref[...] = acc
    return kernel


# ----------------------------- wrappers ------------------------------------

def _nconv_chain(a_pad, x2d_pad, order, tile):
    """All `order` diffusion powers of one support, tiled over columns."""
    vp, mp = x2d_pad.shape
    grid = (mp // tile,)
    in_specs = [
        pl.BlockSpec((vp, vp), lambda j: (0, 0)),        # adjacency, resident
        pl.BlockSpec((vp, tile), lambda j: (0, j)),
    ]
    out_specs = [pl.BlockSpec((vp, tile), lambda j: (0, j)) for _ in range(order)]
    out_shape = [jax.ShapeDtypeStruct((vp, mp), jnp.bfloat16) for _ in range(order)]
    cost = pl.CostEstimate(
        flops=2 * vp * vp * mp * order,
        transcendentals=0,
        bytes_accessed=2 * (vp * vp + (order + 1) * vp * mp),
    )
    outs = pl.pallas_call(
        _nconv_chain_kernel,
        out_shape=out_shape,
        grid=grid,
        in_specs=in_specs,
        out_specs=out_specs,
        compiler_params=pltpu.CompilerParams(dimension_semantics=("parallel",)),
        cost_estimate=cost,
    )(a_pad, x2d_pad)
    return list(outs)


def _conv1x1_fused(terms2d, w3, b_col, tile):
    """Fused concat + Conv2d(1x1): per column tile, acc = b + sum_k W_k @ H_k."""
    k = len(terms2d)
    c8, np_cols = terms2d[0].shape
    co = w3.shape[1]
    grid = (np_cols // tile,)
    in_specs = [
        pl.BlockSpec((k, co, c8), lambda j: (0, 0, 0)),  # whole weight, resident
        pl.BlockSpec((co, 1), lambda j: (0, 0)),         # bias, resident
    ] + [pl.BlockSpec((c8, tile), lambda j: (0, j)) for _ in range(k)]
    out_specs = pl.BlockSpec((co, tile), lambda j: (0, j))
    cost = pl.CostEstimate(
        flops=2 * k * co * c8 * np_cols,
        transcendentals=0,
        bytes_accessed=2 * (k * co * c8 + k * c8 * np_cols)
        + 4 * (co + co * np_cols),
    )
    return pl.pallas_call(
        _make_conv1x1_acc_kernel(k),
        out_shape=jax.ShapeDtypeStruct((co, np_cols), jnp.float32),
        grid=grid,
        in_specs=in_specs,
        out_specs=out_specs,
        compiler_params=pltpu.CompilerParams(dimension_semantics=("parallel",)),
        cost_estimate=cost,
    )(w3, b_col, *terms2d)


def multi_gcn_forward(x, supports, W, b, order=2, dropout=0.3, col_tile=1024):
    """Matches multi_gcn.forward (inference/eval semantics); output is f32."""
    N, C, V, L = x.shape
    Co, KC = W.shape
    K = order * len(supports) + 1
    assert KC == K * C, "W must have (order*support_len+1)*c_in input channels"

    v_pad = _round_up(V, 128)
    c8 = _round_up(C, 8)

    # ---- stage 1: chained nconv powers in flattened (V, N*C*L) layout -----
    # nconv semantics (PyTorch: A = A.T then einsum('ncvl,vw->ncwl')):
    #   y[n,c,w,l] = sum_v A[w,v] * x[n,c,v,l]  ==  A @ x2d  in this layout.
    m = N * C * L
    tn = _pick_col_tile(m, col_tile)
    m_pad = _round_up(m, tn)
    x2d = jnp.transpose(x, (2, 0, 1, 3)).reshape(V, m).astype(jnp.bfloat16)
    x2d = jnp.pad(x2d, ((0, v_pad - V), (0, m_pad - m)))

    # ---- conv-layout (C8, N*V*L) views for the fused concat + 1x1 conv ----
    nvl = N * V * L
    tn2 = _pick_col_tile(nvl, col_tile)
    nvl_pad = _round_up(nvl, tn2)

    def conv_layout_from_ncvl(t):                       # (N, C, V, L) -> (C8, NVL_pad)
        h = jnp.transpose(t, (1, 0, 2, 3)).reshape(C, nvl)
        return jnp.pad(h, ((0, c8 - C), (0, nvl_pad - nvl)))

    def conv_layout_from_v2d(t2d):                      # (V_pad, M_pad) -> (C8, NVL_pad)
        t = t2d[:V, :m].reshape(V, N, C, L)
        h = jnp.transpose(t, (2, 1, 0, 3)).reshape(C, nvl)
        return jnp.pad(h, ((0, c8 - C), (0, nvl_pad - nvl)))

    terms = [conv_layout_from_ncvl(x.astype(jnp.bfloat16))]
    for a in supports:
        a_pad = jnp.pad(a.astype(jnp.bfloat16),
                        ((0, v_pad - V), (0, v_pad - V)))
        for power in _nconv_chain(a_pad, x2d, order, tn):
            terms.append(conv_layout_from_v2d(power))

    # ---- stage 2: fused concat + Conv2d(1x1) with per-term accumulation ---
    w3 = jnp.pad(W.reshape(Co, K, C).transpose(1, 0, 2).astype(jnp.bfloat16),
                 ((0, 0), (0, 0), (0, c8 - C)))         # (K, Co, C8)
    b_col = b.astype(jnp.float32).reshape(Co, 1)
    out2d = _conv1x1_fused(terms, w3, b_col, tn2)       # (Co, NVL_pad) f32

    out = out2d[:, :nvl].reshape(Co, N, V, L).transpose(1, 0, 2, 3)
    # TODO(synk): F.dropout(p, training=True) is stochastic; inference-mode
    # (identity) semantics are implemented here.
    return out


# ----------------------------- demo / self-check ---------------------------

if __name__ == "__main__":
    key = jax.random.PRNGKey(0)
    N, C_in, V, L = 2, 4, 16, 8
    support_len, order, c_out = 3, 2, 8
    c_total = (order * support_len + 1) * C_in  # 28

    keys = jax.random.split(key, 3 + support_len)
    x = jax.random.normal(keys[0], (N, C_in, V, L), dtype=jnp.float32)
    supports = [
        jax.random.normal(keys[3 + i], (V, V), dtype=jnp.float32) * 0.1
        for i in range(support_len)
    ]

    # Conv2d(c_total, c_out, kernel_size=(1,1), bias=True) parameters.
    bound = 1.0 / (c_total ** 0.5)
    W = jax.random.uniform(keys[1], (c_out, c_total), jnp.float32, -bound, bound)
    b = jax.random.uniform(keys[2], (c_out,), jnp.float32, -bound, bound)

    fwd = jax.jit(functools.partial(multi_gcn_forward, order=order))
    out = jax.block_until_ready(fwd(x, supports, W, b))
    assert out.shape == (N, c_out, V, L)

    # Pure-JAX reference with the same bf16-input / f32-accumulate recipe.
    xb = x.astype(jnp.bfloat16)

    def ref_nconv(t, a):
        y = jnp.einsum("ncvl,wv->ncwl", t, a.astype(jnp.bfloat16),
                       preferred_element_type=jnp.float32)
        return y.astype(jnp.bfloat16)

    ref_terms = [xb]
    for a in supports:
        t1 = ref_nconv(xb, a)
        ref_terms.append(t1)
        for _ in range(2, order + 1):
            t2 = ref_nconv(t1, a)
            ref_terms.append(t2)
            t1 = t2
    hr = jnp.concatenate(ref_terms, axis=1)
    ref = jnp.einsum("oc,ncvl->novl", W.astype(jnp.bfloat16), hr,
                     preferred_element_type=jnp.float32)
    ref = ref + b[None, :, None, None]

    assert jnp.allclose(out, ref, atol=1e-2, rtol=1e-2), \
        "Pallas output mismatch vs reference"
    print("KERNEL_OK")
</pallas_src>

<mosaic_0001>
module attributes {stable_mosaic.version = 11 : i64} {
  func.func @_nconv_chain_kernel(%arg0: i32, %arg1: memref<128x128xbf16, #tpu.memory_space<vmem>>, %arg2: memref<128x128xbf16, #tpu.memory_space<vmem>>, %arg3: memref<128x128xbf16, #tpu.memory_space<vmem>>, %arg4: memref<128x128xbf16, #tpu.memory_space<vmem>>) attributes {dimension_semantics = [#tpu.dimension_semantics<parallel>], iteration_bounds = array<i64: 1>, scalar_prefetch = 0 : i64, scratch_operands = 0 : i64, tpu.core_type = #tpu.core_type<tc>, window_params = [{pipeline_mode = #tpu.pipeline_mode<synchronous>, transform_indices = @transform_0, window_bounds = array<i64: 128, 128>}, {transform_indices = @transform_1, window_bounds = array<i64: 128, 128>}, {transform_indices = @transform_2, window_bounds = array<i64: 128, 128>}, {transform_indices = @transform_3, window_bounds = array<i64: 128, 128>}]} {
    %c0 = arith.constant 0 : index
    %c0_0 = arith.constant 0 : index
    %0 = vector.load %arg1[%c0, %c0_0] : memref<128x128xbf16, #tpu.memory_space<vmem>>, vector<128x128xbf16>
    %c0_1 = arith.constant 0 : index
    %c0_2 = arith.constant 0 : index
    %1 = vector.load %arg2[%c0_1, %c0_2] : memref<128x128xbf16, #tpu.memory_space<vmem>>, vector<128x128xbf16>
    %cst = arith.constant dense<0.000000e+00> : vector<128x128xf32>
    %2 = tpu.matmul %0, %1, %cst {dimension_numbers = #tpu.dot_dimension_numbers<[1], [0], [0], [1], [0, 0, 1, 1], [], []>} : vector<128x128xbf16>, vector<128x128xbf16>, vector<128x128xf32> -> vector<128x128xf32>
    %3 = arith.truncf %2 : vector<128x128xf32> to vector<128x128xbf16>
    %c0_3 = arith.constant 0 : index
    %c0_4 = arith.constant 0 : index
    %4 = vector.load %arg3[%c0_3, %c0_4] : memref<128x128xbf16, #tpu.memory_space<vmem>>, vector<128x128xbf16>
    tpu.vector_store %arg3[%c0_3, %c0_4], %3 {strides = array<i32>} : memref<128x128xbf16, #tpu.memory_space<vmem>>, vector<128x128xbf16>,
    %5 = arith.truncf %2 : vector<128x128xf32> to vector<128x128xbf16>
    %cst_5 = arith.constant dense<0.000000e+00> : vector<128x128xf32>
    %6 = tpu.matmul %0, %5, %cst_5 {dimension_numbers = #tpu.dot_dimension_numbers<[1], [0], [0], [1], [0, 0, 1, 1], [], []>} : vector<128x128xbf16>, vector<128x128xbf16>, vector<128x128xf32> -> vector<128x128xf32>
    %7 = arith.truncf %6 : vector<128x128xf32> to vector<128x128xbf16>
    %c0_6 = arith.constant 0 : index
    %c0_7 = arith.constant 0 : index
    %8 = vector.load %arg4[%c0_6, %c0_7] : memref<128x128xbf16, #tpu.memory_space<vmem>>, vector<128x128xbf16>
    tpu.vector_store %arg4[%c0_6, %c0_7], %7 {strides = array<i32>} : memref<128x128xbf16, #tpu.memory_space<vmem>>, vector<128x128xbf16>,
    return
  }
  func.func @transform_0(%arg0: i32) -> (i32, i32) {
    %c0_i32 = arith.constant 0 : i32
    %c0_i32_0 = arith.constant 0 : i32
    %c0_i32_1 = arith.constant 0 : i32
    return %c0_i32, %c0_i32_0 : i32, i32
  }
  func.func @transform_1(%arg0: i32) -> (i32, i32) {
    %c0_i32 = arith.constant 0 : i32
    %c0_i32_0 = arith.constant 0 : i32
    return %c0_i32, %arg0 : i32, i32
  }
  func.func @transform_2(%arg0: i32) -> (i32, i32) {
    %c0_i32 = arith.constant 0 : i32
    %c0_i32_0 = arith.constant 0 : i32
    return %c0_i32, %arg0 : i32, i32
  }
  func.func @transform_3(%arg0: i32) -> (i32, i32) {
    %c0_i32 = arith.constant 0 : i32
    %c0_i32_0 = arith.constant 0 : i32
    return %c0_i32, %arg0 : i32, i32
  }
}

module attributes {stable_mosaic.version = 11 : i64} {
  func.func @kernel(%arg0: i32, %arg1: memref<7x8x8xbf16, #tpu.memory_space<vmem>>, %arg2: memref<8x1xf32, #tpu.memory_space<vmem>>, %arg3: memref<8x256xbf16, #tpu.memory_space<vmem>>, %arg4: memref<8x256xbf16, #tpu.memory_space<vmem>>, %arg5: memref<8x256xbf16, #tpu.memory_space<vmem>>, %arg6: memref<8x256xbf16, #tpu.memory_space<vmem>>, %arg7: memref<8x256xbf16, #tpu.memory_space<vmem>>, %arg8: memref<8x256xbf16, #tpu.memory_space<vmem>>, %arg9: memref<8x256xbf16, #tpu.memory_space<vmem>>, %arg10: memref<8x256xf32, #tpu.memory_space<vmem>>) attributes {dimension_semantics = [#tpu.dimension_semantics<parallel>], iteration_bounds = array<i64: 1>, scalar_prefetch = 0 : i64, scratch_operands = 0 : i64, tpu.core_type = #tpu.core_type<tc>, window_params = [{pipeline_mode = #tpu.pipeline_mode<synchronous>, transform_indices = @transform_0, window_bounds = array<i64: 7, 8, 8>}, {pipeline_mode = #tpu.pipeline_mode<synchronous>, transform_indices = @transform_1, window_bounds = array<i64: 8, 1>}, {transform_indices = @transform_2, window_bounds = array<i64: 8, 256>}, {transform_indices = @transform_3, window_bounds = array<i64: 8, 256>}, {transform_indices = @transform_4, window_bounds = array<i64: 8, 256>}, {transform_indices = @transform_5, window_bounds = array<i64: 8, 256>}, {transform_indices = @transform_6, window_bounds = array<i64: 8, 256>}, {transform_indices = @transform_7, window_bounds = array<i64: 8, 256>}, {transform_indices = @transform_8, window_bounds = array<i64: 8, 256>}, {transform_indices = @transform_9, window_bounds = array<i64: 8, 256>}]} {
    %c0 = arith.constant 0 : index
    %c0_0 = arith.constant 0 : index
    %0 = vector.load %arg2[%c0, %c0_0] : memref<8x1xf32, #tpu.memory_space<vmem>>, vector<8x1xf32>
    %1 = vector.shape_cast %0 : vector<8x1xf32> to vector<8x1xf32>
    %2 = vector.broadcast %1 : vector<8x1xf32> to vector<8x256xf32>
    %c0_1 = arith.constant 0 : index
    %c0_2 = arith.constant 0 : index
    %c0_3 = arith.constant 0 : index
    %3 = vector.load %arg1[%c0_1, %c0_2, %c0_3] : memref<7x8x8xbf16, #tpu.memory_space<vmem>>, vector<1x8x8xbf16>
    %4 = vector.shape_cast %3 : vector<1x8x8xbf16> to vector<8x8xbf16>
    %c0_4 = arith.constant 0 : index
    %c0_5 = arith.constant 0 : index
    %5 = vector.load %arg3[%c0_4, %c0_5] : memref<8x256xbf16, #tpu.memory_space<vmem>>, vector<8x256xbf16>
    %cst = arith.constant dense<0.000000e+00> : vector<8x256xf32>
    %6 = tpu.matmul %4, %5, %cst {dimension_numbers = #tpu.dot_dimension_numbers<[1], [0], [0], [1], [0, 0, 1, 1], [], []>} : vector<8x8xbf16>, vector<8x256xbf16>, vector<8x256xf32> -> vector<8x256xf32>
    %7 = arith.addf %2, %6 : vector<8x256xf32>
    %c1 = arith.constant 1 : index
    %c0_6 = arith.constant 0 : index
    %c0_7 = arith.constant 0 : index
    %8 = vector.load %arg1[%c1, %c0_6, %c0_7] : memref<7x8x8xbf16, #tpu.memory_space<vmem>>, vector<1x8x8xbf16>
    %9 = vector.shape_cast %8 : vector<1x8x8xbf16> to vector<8x8xbf16>
    %c0_8 = arith.constant 0 : index
    %c0_9 = arith.constant 0 : index
    %10 = vector.load %arg4[%c0_8, %c0_9] : memref<8x256xbf16, #tpu.memory_space<vmem>>, vector<8x256xbf16>
    %cst_10 = arith.constant dense<0.000000e+00> : vector<8x256xf32>
    %11 = tpu.matmul %9, %10, %cst_10 {dimension_numbers = #tpu.dot_dimension_numbers<[1], [0], [0], [1], [0, 0, 1, 1], [], []>} : vector<8x8xbf16>, vector<8x256xbf16>, vector<8x256xf32> -> vector<8x256xf32>
    %12 = arith.addf %7, %11 : vector<8x256xf32>
    %c2 = arith.constant 2 : index
    %c0_11 = arith.constant 0 : index
    %c0_12 = arith.constant 0 : index
    %13 = vector.load %arg1[%c2, %c0_11, %c0_12] : memref<7x8x8xbf16, #tpu.memory_space<vmem>>, vector<1x8x8xbf16>
    %14 = vector.shape_cast %13 : vector<1x8x8xbf16> to vector<8x8xbf16>
    %c0_13 = arith.constant 0 : index
    %c0_14 = arith.constant 0 : index
    %15 = vector.load %arg5[%c0_13, %c0_14] : memref<8x256xbf16, #tpu.memory_space<vmem>>, vector<8x256xbf16>
    %cst_15 = arith.constant dense<0.000000e+00> : vector<8x256xf32>
    %16 = tpu.matmul %14, %15, %cst_15 {dimension_numbers = #tpu.dot_dimension_numbers<[1], [0], [0], [1], [0, 0, 1, 1], [], []>} : vector<8x8xbf16>, vector<8x256xbf16>, vector<8x256xf32> -> vector<8x256xf32>
    %17 = arith.addf %12, %16 : vector<8x256xf32>
    %c3 = arith.constant 3 : index
    %c0_16 = arith.constant 0 : index
    %c0_17 = arith.constant 0 : index
    %18 = vector.load %arg1[%c3, %c0_16, %c0_17] : memref<7x8x8xbf16, #tpu.memory_space<vmem>>, vector<1x8x8xbf16>
    %19 = vector.shape_cast %18 : vector<1x8x8xbf16> to vector<8x8xbf16>
    %c0_18 = arith.constant 0 : index
    %c0_19 = arith.constant 0 : index
    %20 = vector.load %arg6[%c0_18, %c0_19] : memref<8x256xbf16, #tpu.memory_space<vmem>>, vector<8x256xbf16>
    %cst_20 = arith.constant dense<0.000000e+00> : vector<8x256xf32>
    %21 = tpu.matmul %19, %20, %cst_20 {dimension_numbers = #tpu.dot_dimension_numbers<[1], [0], [0], [1], [0, 0, 1, 1], [], []>} : vector<8x8xbf16>, vector<8x256xbf16>, vector<8x256xf32> -> vector<8x256xf32>
    %22 = arith.addf %17, %21 : vector<8x256xf32>
    %c4 = arith.constant 4 : index
    %c0_21 = arith.constant 0 : index
    %c0_22 = arith.constant 0 : index
    %23 = vector.load %arg1[%c4, %c0_21, %c0_22] : memref<7x8x8xbf16, #tpu.memory_space<vmem>>, vector<1x8x8xbf16>
    %24 = vector.shape_cast %23 : vector<1x8x8xbf16> to vector<8x8xbf16>
    %c0_23 = arith.constant 0 : index
    %c0_24 = arith.constant 0 : index
    %25 = vector.load %arg7[%c0_23, %c0_24] : memref<8x256xbf16, #tpu.memory_space<vmem>>, vector<8x256xbf16>
    %cst_25 = arith.constant dense<0.000000e+00> : vector<8x256xf32>
    %26 = tpu.matmul %24, %25, %cst_25 {dimension_numbers = #tpu.dot_dimension_numbers<[1], [0], [0], [1], [0, 0, 1, 1], [], []>} : vector<8x8xbf16>, vector<8x256xbf16>, vector<8x256xf32> -> vector<8x256xf32>
    %27 = arith.addf %22, %26 : vector<8x256xf32>
    %c5 = arith.constant 5 : index
    %c0_26 = arith.constant 0 : index
    %c0_27 = arith.constant 0 : index
    %28 = vector.load %arg1[%c5, %c0_26, %c0_27] : memref<7x8x8xbf16, #tpu.memory_space<vmem>>, vector<1x8x8xbf16>
    %29 = vector.shape_cast %28 : vector<1x8x8xbf16> to vector<8x8xbf16>
    %c0_28 = arith.constant 0 : index
    %c0_29 = arith.constant 0 : index
    %30 = vector.load %arg8[%c0_28, %c0_29] : memref<8x256xbf16, #tpu.memory_space<vmem>>, vector<8x256xbf16>
    %cst_30 = arith.constant dense<0.000000e+00> : vector<8x256xf32>
    %31 = tpu.matmul %29, %30, %cst_30 {dimension_numbers = #tpu.dot_dimension_numbers<[1], [0], [0], [1], [0, 0, 1, 1], [], []>} : vector<8x8xbf16>, vector<8x256xbf16>, vector<8x256xf32> -> vector<8x256xf32>
    %32 = arith.addf %27, %31 : vector<8x256xf32>
    %c6 = arith.constant 6 : index
    %c0_31 = arith.constant 0 : index
    %c0_32 = arith.constant 0 : index
    %33 = vector.load %arg1[%c6, %c0_31, %c0_32] : memref<7x8x8xbf16, #tpu.memory_space<vmem>>, vector<1x8x8xbf16>
    %34 = vector.shape_cast %33 : vector<1x8x8xbf16> to vector<8x8xbf16>
    %c0_33 = arith.constant 0 : index
    %c0_34 = arith.constant 0 : index
    %35 = vector.load %arg9[%c0_33, %c0_34] : memref<8x256xbf16, #tpu.memory_space<vmem>>, vector<8x256xbf16>
    %cst_35 = arith.constant dense<0.000000e+00> : vector<8x256xf32>
    %36 = tpu.matmul %34, %35, %cst_35 {dimension_numbers = #tpu.dot_dimension_numbers<[1], [0], [0], [1], [0, 0, 1, 1], [], []>} : vector<8x8xbf16>, vector<8x256xbf16>, vector<8x256xf32> -> vector<8x256xf32>
    %37 = arith.addf %32, %36 : vector<8x256xf32>
    %c0_36 = arith.constant 0 : index
    %c0_37 = arith.constant 0 : index
    %38 = vector.load %arg10[%c0_36, %c0_37] : memref<8x256xf32, #tpu.memory_space<vmem>>, vector<8x256xf32>
    tpu.vector_store %arg10[%c0_36, %c0_37], %37 {strides = array<i32>} : memref<8x256xf32, #tpu.memory_space<vmem>>, vector<8x256xf32>,
    return
  }
  func.func @transform_0(%arg0: i32) -> (i32, i32, i32) {
    %c0_i32 = arith.constant 0 : i32
    %c0_i32_0 = arith.constant 0 : i32
    %c0_i32_1 = arith.constant 0 : i32
    %c0_i32_2 = arith.constant 0 : i32
    return %c0_i32, %c0_i32_0, %c0_i32_1 : i32, i32, i32
  }
  func.func @transform_1(%arg0: i32) -> (i32, i32) {
    %c0_i32 = arith.constant 0 : i32
    %c0_i32_0 = arith.constant 0 : i32
    %c0_i32_1 = arith.constant 0 : i32
    return %c0_i32, %c0_i32_0 : i32, i32
  }
  func.func @transform_2(%arg0: i32) -> (i32, i32) {
    %c0_i32 = arith.constant 0 : i32
    %c0_i32_0 = arith.constant 0 : i32
    return %c0_i32, %arg0 : i32, i32
  }
  func.func @transform_3(%arg0: i32) -> (i32, i32) {
    %c0_i32 = arith.constant 0 : i32
    %c0_i32_0 = arith.constant 0 : i32
    return %c0_i32, %arg0 : i32, i32
  }
  func.func @transform_4(%arg0: i32) -> (i32, i32) {
    %c0_i32 = arith.constant 0 : i32
    %c0_i32_0 = arith.constant 0 : i32
    return %c0_i32, %arg0 : i32, i32
  }
  func.func @transform_5(%arg0: i32) -> (i32, i32) {
    %c0_i32 = arith.constant 0 : i32
    %c0_i32_0 = arith.constant 0 : i32
    return %c0_i32, %arg0 : i32, i32
  }
  func.func @transform_6(%arg0: i32) -> (i32, i32) {
    %c0_i32 = arith.constant 0 : i32
    %c0_i32_0 = arith.constant 0 : i32
    return %c0_i32, %arg0 : i32, i32
  }
  func.func @transform_7(%arg0: i32) -> (i32, i32) {
    %c0_i32 = arith.constant 0 : i32
    %c0_i32_0 = arith.constant 0 : i32
    return %c0_i32, %arg0 : i32, i32
  }
  func.func @transform_8(%arg0: i32) -> (i32, i32) {
    %c0_i32 = arith.constant 0 : i32
    %c0_i32_0 = arith.constant 0 : i32
    return %c0_i32, %arg0 : i32, i32
  }
  func.func @transform_9(%arg0: i32) -> (i32, i32) {
    %c0_i32 = arith.constant 0 : i32
    %c0_i32_0 = arith.constant 0 : i32
    return %c0_i32, %arg0 : i32, i32
  }
}

</mosaic_0001>

<bundles_post_ra>
// kernel: multi_gcn_forward.5
= control target key start
LH: loop header
LB: loop body
LE: loop exit
PB: predicated region body
PF: predicated region fallthrough
CT: control target
= control target key end

     0   :  { %s910_s1 = inlined_call_operand.vmem [shape: bf16[128,128], index: 1, kind: input, shape index: {}]   ;;  %s911_s0 = inlined_call_operand.vmem [shape: bf16[128,128], index: 0, kind: input, shape index: {}]   ;;  %s912_s2 = inlined_call_operand.vmem [shape: bf16[128,128], index: 2, kind: output, shape index: {0}]   ;;  %s913_s3 = inlined_call_operand.vmem [shape: bf16[128,128], index: 3, kind: output, shape index: {1}]  }
   0x1   :  { %v774_v0 = vld [vmem:[%s910_s1 + $0x38] sm:$0xff]   ;;  %v775_v1 = vld [vmem:[%s910_s1 + $0x30] sm:$0xff]   ;;  %v776_v2 = vld [vmem:[%s910_s1 + $0x28] sm:$0xff]  }
   0x2   :  { %710 = vmatprep.subr.bf16.mxu0 %v774_v0  ;;  %v777_v3 = vld [vmem:[%s910_s1 + $0x20] sm:$0xff]   ;;  %v778_v5 = vld [vmem:[%s910_s1 + $0x18] sm:$0xff]   ;;  %v779_v6 = vld [vmem:[%s910_s1 + $0x10] sm:$0xff]  }
   0x3   :  { %711 = vmatpush3.bf16.msra.mxu0 %v774_v0  ;;  %v782_v4 = vld [vmem:[%s911_s0] sm:$0xff]   ;;  %v780_v7 = vld [vmem:[%s910_s1 + $0x8] sm:$0xff]   ;;  %v784_v10 = vld [vmem:[%s911_s0 + $0x10] sm:$0xff]  }
   0x4   :  { %712 = vmatprep.subr.bf16.mxu0 %v775_v1  ;;  %726 = vmatprep.mubr.bf16.mxu0 %v782_v4  ;;  %v781_v8 = vld [vmem:[%s910_s1] sm:$0xff]   ;;  %v840_v9 = vld [vmem:[%s911_s0 + $0x8] sm:$0xff]   ;;  %v785_v11 = vld [vmem:[%s911_s0 + $0x18] sm:$0xff]  }
   0x5   :  { %758 = vmatprep.mubr.bf16.mxu1 %v782_v4  ;;  %v786_v12 = vld [vmem:[%s911_s0 + $0x20] sm:$0xff]   ;;  %v787_v13 = vld [vmem:[%s911_s0 + $0x28] sm:$0xff]   ;;  %v788_v14 = vld [vmem:[%s911_s0 + $0x30] sm:$0xff]  }
   0x6   :  { %v789_v15 = vld [vmem:[%s911_s0 + $0x38] sm:$0xff]  }
   0x7   :  { %713 = vmatpush3.bf16.msra.mxu0 %v775_v1 }
   0x8   :  { %714 = vmatprep.subr.bf16.mxu0 %v776_v2 }
   0xb   :  { %715 = vmatpush3.bf16.msra.mxu0 %v776_v2 }
   0xc   :  { %716 = vmatprep.subr.bf16.mxu0 %v777_v3 }
   0xf   :  { %717 = vmatpush3.bf16.msra.mxu0 %v777_v3 }
  0x10   :  { %718 = vmatprep.subr.bf16.mxu0 %v778_v5 }
  0x13   :  { %719 = vmatpush3.bf16.msra.mxu0 %v778_v5 }
  0x14   :  { %720 = vmatprep.subr.bf16.mxu0 %v779_v6 }
  0x17   :  { %721 = vmatpush3.bf16.msra.mxu0 %v779_v6 }
  0x18   :  { %722 = vmatprep.subr.bf16.mxu0 %v780_v7 }
  0x1b   :  { %723 = vmatpush3.bf16.msra.mxu0 %v780_v7 }
  0x1c   :  { %724 = vmatprep.subr.bf16.mxu0 %v781_v8 }
  0x1f   :  { %725 = vmatpush3.bf16.msra.mxu0 %v781_v8 }
  0x22   :  { %727 = vmatmul.mubr.bf16.vlgmr.msra.gmra.mxu0 %v840_v9 }
  0x23   :  { %730 = vmatprep.mubr.bf16.mxu0 %v784_v10 }
  0x2a   :  { %731 = vmatmul.mubr.bf16.gmra.mxu0 %v785_v11 }
  0x2b   :  { %734 = vmatprep.mubr.bf16.mxu0 %v786_v12 }
  0x32   :  { %735 = vmatmul.mubr.bf16.gmra.mxu0 %v787_v13 }
  0x33   :  { %738 = vmatprep.mubr.bf16.mxu0 %v788_v14 }
  0x3a   :  { %739 = vmatmul.mubr.bf16.gmra.mxu0 %v789_v15 }
  0xe2   :  { %v728_v16 = vpop.f32.mrf.mxu0 }
  0xe4   :  { %v176_v17 = vpop.f32.mrf.mxu0 }
  0xe6   :  { %v729_v18 = vpop.f32.mrf.mxu0 }
  0xe7   :  { %v240_v19 = vpack.c.bf16 %v729_v18, %v728_v16 }
  0xe8   :  { %v179_v20 = vpop.f32.mrf.mxu0 }
  0xe9   :  { %664 = vst [vmem:[%s912_s2 + $0x8] sm:$0xff] %v240_v19   ;;  %v239_v21 = vpack.c.bf16 %v179_v20, %v176_v17 }
  0xea   :  { %v732_v22 = vpop.f32.mrf.mxu0 }
  0xeb   :  { %588 = vst [vmem:[%s912_s2] sm:$0xff] %v239_v21  }
  0xec   :  { %v192_v23 = vpop.f32.mrf.mxu0 }
  0xee   :  { %v733_v24 = vpop.f32.mrf.mxu0 }
  0xef   :  { %v242_v25 = vpack.c.bf16 %v733_v24, %v732_v22 }
  0xf0   :  { %v195_v26 = vpop.f32.mrf.mxu0 }
  0xf1   :  { %666 = vst [vmem:[%s912_s2 + $0x18] sm:$0xff] %v242_v25   ;;  %v241_v27 = vpack.c.bf16 %v195_v26, %v192_v23 }
  0xf2   :  { %v736_v28 = vpop.f32.mrf.mxu0 }
  0xf3   :  { %665 = vst [vmem:[%s912_s2 + $0x10] sm:$0xff] %v241_v27  }
  0xf4   :  { %v208_v29 = vpop.f32.mrf.mxu0 }
  0xf6   :  { %v737_v30 = vpop.f32.mrf.mxu0 }
  0xf7   :  { %v244_v31 = vpack.c.bf16 %v737_v30, %v736_v28 }
  0xf8   :  { %v211_v32 = vpop.f32.mrf.mxu0 }
  0xf9   :  { %668 = vst [vmem:[%s912_s2 + $0x28] sm:$0xff] %v244_v31   ;;  %v243_v33 = vpack.c.bf16 %v211_v32, %v208_v29 }
  0xfa   :  { %v740_v34 = vpop.f32.mrf.mxu0 }
  0xfb   :  { %667 = vst [vmem:[%s912_s2 + $0x20] sm:$0xff] %v243_v33  }
  0xfc   :  { %v224_v35 = vpop.f32.mrf.mxu0 }
  0xfe   :  { %v741_v36 = vpop.f32.mrf.mxu0 }
  0xff   :  { %v246_v37 = vpack.c.bf16 %v741_v36, %v740_v34 }
 0x100   :  { %v227_v38 = vpop.f32.mrf.mxu0 }
 0x101   :  { %670 = vst [vmem:[%s912_s2 + $0x38] sm:$0xff] %v246_v37   ;;  %v245_v39 = vpack.c.bf16 %v227_v38, %v224_v35  ;;  %742 = vmatprep.subr.bf16.mxu1 %v246_v37 }
 0x102   :  { %743 = vmatpush3.bf16.msra.mxu1 %v246_v37 }
 0x103   :  { %669 = vst [vmem:[%s912_s2 + $0x30] sm:$0xff] %v245_v39   ;;  %744 = vmatprep.subr.bf16.mxu1 %v245_v39 }
 0x106   :  { %745 = vmatpush3.bf16.msra.mxu1 %v245_v39 }
 0x107   :  { %746 = vmatprep.subr.bf16.mxu1 %v244_v31 }
 0x10a   :  { %747 = vmatpush3.bf16.msra.mxu1 %v244_v31 }
 0x10b   :  { %748 = vmatprep.subr.bf16.mxu1 %v243_v33 }
 0x10e   :  { %749 = vmatpush3.bf16.msra.mxu1 %v243_v33 }
 0x10f   :  { %750 = vmatprep.subr.bf16.mxu1 %v242_v25 }
 0x112   :  { %751 = vmatpush3.bf16.msra.mxu1 %v242_v25 }
 0x113   :  { %752 = vmatprep.subr.bf16.mxu1 %v241_v27 }
 0x116   :  { %753 = vmatpush3.bf16.msra.mxu1 %v241_v27 }
 0x117   :  { %754 = vmatprep.subr.bf16.mxu1 %v240_v19 }
 0x11a   :  { %755 = vmatpush3.bf16.msra.mxu1 %v240_v19 }
 0x11b   :  { %756 = vmatprep.subr.bf16.mxu1 %v239_v21 }
 0x11e   :  { %757 = vmatpush3.bf16.msra.mxu1 %v239_v21 }
 0x121   :  { %759 = vmatmul.mubr.bf16.vlgmr.msra.gmra.mxu1 %v840_v9 }
 0x122   :  { %762 = vmatprep.mubr.bf16.mxu1 %v784_v10 }
 0x129   :  { %763 = vmatmul.mubr.bf16.gmra.mxu1 %v785_v11 }
 0x12a   :  { %766 = vmatprep.mubr.bf16.mxu1 %v786_v12 }
 0x131   :  { %767 = vmatmul.mubr.bf16.gmra.mxu1 %v787_v13 }
 0x132   :  { %770 = vmatprep.mubr.bf16.mxu1 %v788_v14 }
 0x139   :  { %771 = vmatmul.mubr.bf16.gmra.mxu1 %v789_v15 }
 0x1e1   :  { %v760_v40 = vpop.f32.mrf.mxu1 }
 0x1e3   :  { %v353_v41 = vpop.f32.mrf.mxu1 }
 0x1e5   :  { %v761_v42 = vpop.f32.mrf.mxu1 }
 0x1e6   :  { %v632_v43 = vpack.c.bf16 %v761_v42, %v760_v40 }
 0x1e7   :  { %v356_v44 = vpop.f32.mrf.mxu1 }
 0x1e8   :  { %671 = vst [vmem:[%s913_s3 + $0x8] sm:$0xff] %v632_v43   ;;  %v627_v45 = vpack.c.bf16 %v356_v44, %v353_v41 }
 0x1e9   :  { %v764_v46 = vpop.f32.mrf.mxu1 }
 0x1ea   :  { %628 = vst [vmem:[%s913_s3] sm:$0xff] %v627_v45  }
 0x1eb   :  { %v369_v47 = vpop.f32.mrf.mxu1 }
 0x1ed   :  { %v765_v48 = vpop.f32.mrf.mxu1 }
 0x1ee   :  { %v642_v49 = vpack.c.bf16 %v765_v48, %v764_v46 }
 0x1ef   :  { %v372_v50 = vpop.f32.mrf.mxu1 }
 0x1f0   :  { %673 = vst [vmem:[%s913_s3 + $0x18] sm:$0xff] %v642_v49   ;;  %v637_v51 = vpack.c.bf16 %v372_v50, %v369_v47 }
 0x1f1   :  { %v768_v52 = vpop.f32.mrf.mxu1 }
 0x1f2   :  { %672 = vst [vmem:[%s913_s3 + $0x10] sm:$0xff] %v637_v51  }
 0x1f3   :  { %v385_v53 = vpop.f32.mrf.mxu1 }
 0x1f5   :  { %v769_v54 = vpop.f32.mrf.mxu1 }
 0x1f6   :  { %v652_v55 = vpack.c.bf16 %v769_v54, %v768_v52 }
 0x1f7   :  { %v388_v56 = vpop.f32.mrf.mxu1 }
 0x1f8   :  { %675 = vst [vmem:[%s913_s3 + $0x28] sm:$0xff] %v652_v55   ;;  %v647_v57 = vpack.c.bf16 %v388_v56, %v385_v53 }
 0x1f9   :  { %v772_v58 = vpop.f32.mrf.mxu1 }
 0x1fa   :  { %674 = vst [vmem:[%s913_s3 + $0x20] sm:$0xff] %v647_v57  }
 0x1fb   :  { %v401_v59 = vpop.f32.mrf.mxu1 }
 0x1fd   :  { %v773_v60 = vpop.f32.mrf.mxu1 }
 0x1fe   :  { %v662_v61 = vpack.c.bf16 %v773_v60, %v772_v58 }
 0x1ff   :  { %v404_v62 = vpop.f32.mrf.mxu1 }
 0x200   :  { %677 = vst [vmem:[%s913_s3 + $0x38] sm:$0xff] %v662_v61   ;;  %v657_v63 = vpack.c.bf16 %v404_v62, %v401_v59 }
 0x202   :  { %676 = vst [vmem:[%s913_s3 + $0x30] sm:$0xff] %v657_v63  }

// kernel: multi_gcn_forward.7
= control target key start
LH: loop header
LB: loop body
LE: loop exit
PB: predicated region body
PF: predicated region fallthrough
CT: control target
= control target key end

     0   :  { %vm50_vm0 = vcmask 1043456   ;;  %v516_v2 = vmov 0   ;;  %vm46_vm1 = vcmask 64512   ;;  %s647_s2 = inlined_call_operand.vmem [shape: bf16[8,256], index: 2, kind: input, shape index: {}]   ;;  %s648_s3 = inlined_call_operand.vmem [shape: bf16[8,256], index: 3, kind: input, shape index: {}]   ;;  %s649_s4 = inlined_call_operand.vmem [shape: bf16[8,256], index: 4, kind: input, shape index: {}]   ;;  %s650_s5 = inlined_call_operand.vmem [shape: bf16[8,256], index: 5, kind: input, shape index: {}]   ;;  %s651_s6 = inlined_call_operand.vmem [shape: bf16[8,256], index: 6, kind: input, shape index: {}]   ;;  %s652_s7 = inlined_call_operand.vmem [shape: bf16[8,256], index: 7, kind: input, shape index: {}]   ;;  %s653_s0 = inlined_call_operand.vmem [shape: bf16[7,8,8], index: 0, kind: input, shape index: {}]   ;;  %s654_s1 = inlined_call_operand.vmem [shape: f32[8,1], index: 1, kind: input, shape index: {}]   ;;  %s655_s8 = inlined_call_operand.vmem [shape: bf16[8,256], index: 8, kind: input, shape index: {}]   ;;  %s656_s9 = inlined_call_operand.vmem [shape: f32[8,256], index: 9, kind: output, shape index: {}]  }
   0x1   :  { %v40_v0 = vld [vmem:[%s647_s2] sm:$0xff]  ;;  %89 = vmatprep.mubr.bf16.mxu0 %v516_v2  ;;  %149 = vmatprep.mubr.bf16.mxu1 %v516_v2  ;;  %v475_v27 = vld [vmem:[%s653_s0 + $0x8] sm:$0xf]  ;;  %v480_v28 = vld [vmem:[%s653_s0 + $0xc] sm:$0xf] }
   0x2   :  { %v102_v1 = vld [vmem:[%s648_s3] sm:$0xff]  ;;  %v467_v3 = vcombine.high %v40_v0, %v40_v0  ;;  %v466_v4 = vcombine.low %v40_v0, %v40_v0  ;;  %501 = vset.pattern.permute.xlu0 %v516_v2  ;;  %v485_v33 = vld [vmem:[%s653_s0 + $0x10] sm:$0xf]  ;;  %v490_v34 = vld [vmem:[%s653_s0 + $0x14] sm:$0xf] }
   0x3   :  { %v472_v5 = vcombine.high %v102_v1, %v102_v1  ;;  %v471_v6 = vcombine.low %v102_v1, %v102_v1  ;;  %v162_v7 = vld [vmem:[%s649_s4] sm:$0xff]  ;;  %v495_v36 = vld [vmem:[%s653_s0 + $0x18] sm:$0xf] }
   0x4   :  { %v222_v8 = vld [vmem:[%s650_s5] sm:$0xff]  ;;  %v477_v9 = vcombine.high %v162_v7, %v162_v7  ;;  %v476_v10 = vcombine.low %v162_v7, %v162_v7  ;;  %468 = vmatprep.subr.msk.bf16.mxu0 %vm50_vm0, %v467_v3  ;;  %v52_v14 = vsel %vm50_vm0, %v466_v4, 0 }
   0x5   :  { %v482_v11 = vcombine.high %v222_v8, %v222_v8  ;;  %v481_v12 = vcombine.low %v222_v8, %v222_v8  ;;  %v282_v13 = vld [vmem:[%s651_s6] sm:$0xff]  ;;  %473 = vmatprep.subr.msk.bf16.mxu1 %vm50_vm0, %v472_v5  ;;  %v112_v15 = vsel %vm50_vm0, %v471_v6, 0  ;;  %72 = vmatpush1.bf16.msra.mxu0 %v52_v14 }
   0x6   :  { %v342_v16 = vld [vmem:[%s652_s7] sm:$0xff]  ;;  %132 = vmatpush1.bf16.msra.mxu1 %v112_v15  ;;  %478 = vmatprep.subr.msk.bf16.mxu0 %vm50_vm0, %v477_v9  ;;  %v172_v19 = vsel %vm50_vm0, %v476_v10, 0  ;;  %v487_v20 = vcombine.high %v282_v13, %v282_v13  ;;  %v486_v24 = vcombine.low %v282_v13, %v282_v13 }
   0x7   :  { %v39_v17 = vld [vmem:[%s653_s0] sm:$0xf]  ;;  %v470_v18 = vld [vmem:[%s653_s0 + $0x4] sm:$0xf]  ;;  %483 = vmatprep.subr.msk.bf16.mxu1 %vm50_vm0, %v482_v11  ;;  %v232_v22 = vsel %vm50_vm0, %v481_v12, 0  ;;  %v492_v23 = vcombine.high %v342_v16, %v342_v16  ;;  %v491_v25 = vcombine.low %v342_v16, %v342_v16 }
   0x8   :  { %v33_v21 = vld [vmem:[%s654_s1] sm:$0xff]  ;;  %469 = vmatmul.mubr.msk.bf16.vlgmr.msra.gmra.mxu0 %vm46_vm1, %v39_v17  ;;  %v292_v29 = vsel %vm50_vm0, %v486_v24, 0 }
   0x9   :  { %36 = vperm.xlu0 %501, %v33_v21   ;;  %474 = vmatmul.mubr.msk.bf16.vlgmr.msra.gmra.mxu1 %vm46_vm1, %v470_v18  ;;  %v402_v26 = vld [vmem:[%s655_s8] sm:$0xff]  ;;  %v352_v31 = vsel %vm50_vm0, %v491_v25, 0 }
   0xa   :  { %192 = vmatpush1.bf16.msra.mxu0 %v172_v19  ;;  %209 = vmatprep.mubr.bf16.mxu0 %v516_v2  ;;  %v497_v30 = vcombine.high %v402_v26, %v402_v26  ;;  %v496_v32 = vcombine.low %v402_v26, %v402_v26 }
   0xb   :  { %252 = vmatpush1.bf16.msra.mxu1 %v232_v22  ;;  %488 = vmatprep.subr.msk.bf16.mxu0 %vm50_vm0, %v487_v20 }
   0xc   :  { %269 = vmatprep.mubr.bf16.mxu1 %v516_v2  ;;  %493 = vmatprep.subr.msk.bf16.mxu1 %vm50_vm0, %v492_v23  ;;  %v412_v35 = vsel %vm50_vm0, %v496_v32, 0 }
  0x10   :  { %479 = vmatmul.mubr.msk.bf16.vlgmr.msra.gmra.mxu0 %vm46_vm1, %v475_v27 }
  0x11   :  { %484 = vmatmul.mubr.msk.bf16.vlgmr.msra.gmra.mxu1 %vm46_vm1, %v480_v28  ;;  %312 = vmatpush1.bf16.msra.mxu0 %v292_v29 }
  0x12   :  { %329 = vmatprep.mubr.bf16.mxu0 %v516_v2  ;;  %372 = vmatpush1.bf16.msra.mxu1 %v352_v31 }
  0x13   :  { %498 = vmatprep.subr.msk.bf16.mxu0 %vm50_vm0, %v497_v30  ;;  %389 = vmatprep.mubr.bf16.mxu1 %v516_v2 }
  0x18   :  { %489 = vmatmul.mubr.msk.bf16.vlgmr.msra.gmra.mxu0 %vm46_vm1, %v485_v33 }
  0x19   :  { %494 = vmatmul.mubr.msk.bf16.vlgmr.msra.gmra.mxu1 %vm46_vm1, %v490_v34  ;;  %432 = vmatpush1.bf16.msra.mxu0 %v412_v35 }
  0x1a   :  { %449 = vmatprep.mubr.bf16.mxu0 %v516_v2 }
  0x20   :  { %499 = vmatmul.mubr.msk.bf16.vlgmr.msra.gmra.mxu0 %vm46_vm1, %v495_v36 }
  0x84   :  { %v37_v41 = vpop.permute.xlu0 %36 }
  0xc8   :  { %v91_v37 = vpop.f32.mrf.mxu0 }
  0xc9   :  { %v151_v38 = vpop.f32.mrf.mxu1  ;;  %v98_v46 = vadd.f32 %v91_v37, %v37_v41 }
  0xca   :  { %v93_v39 = vpop.f32.mrf.mxu0 }
  0xcb   :  { %v153_v40 = vpop.f32.mrf.mxu1  ;;  %v99_v49 = vadd.f32 %v93_v39, %v37_v41  ;;  %v158_v52 = vadd.f32 %v151_v38, %v98_v46 }
  0xcc   :  { %v95_v42 = vpop.f32.mrf.mxu0 }
  0xcd   :  { %v155_v43 = vpop.f32.mrf.mxu1  ;;  %v159_v55 = vadd.f32 %v153_v40, %v99_v49 }
  0xce   :  { %v96_v44 = vpop.f32.mrf.mxu0 }
  0xcf   :  { %v156_v45 = vpop.f32.mrf.mxu1 }
  0xd0   :  { %v211_v47 = vpop.f32.mrf.mxu0 }
  0xd1   :  { %v271_v48 = vpop.f32.mrf.mxu1  ;;  %v218_v56 = vadd.f32 %v211_v47, %v158_v52 }
  0xd2   :  { %v213_v50 = vpop.f32.mrf.mxu0 }
  0xd3   :  { %v273_v51 = vpop.f32.mrf.mxu1  ;;  %v219_v59 = vadd.f32 %v213_v50, %v159_v55  ;;  %v278_v62 = vadd.f32 %v271_v48, %v218_v56 }
  0xd4   :  { %v215_v53 = vpop.f32.mrf.mxu0 }
  0xd5   :  { %v275_v54 = vpop.f32.mrf.mxu1  ;;  %v279_v1 = vadd.f32 %v273_v51, %v219_v59 }
  0xd6   :  { %v216_v57 = vpop.f32.mrf.mxu0 }
  0xd7   :  { %v276_v58 = vpop.f32.mrf.mxu1 }
  0xd8   :  { %v331_v60 = vpop.f32.mrf.mxu0 }
  0xd9   :  { %v391_v61 = vpop.f32.mrf.mxu1  ;;  %v338_v2 = vadd.f32 %v331_v60, %v278_v62 }
  0xda   :  { %v333_v63 = vpop.f32.mrf.mxu0 }
  0xdb   :  { %v393_v0 = vpop.f32.mrf.mxu1  ;;  %v339_v5 = vadd.f32 %v333_v63, %v279_v1  ;;  %v398_v8 = vadd.f32 %v391_v61, %v338_v2 }
  0xdc   :  { %v335_v3 = vpop.f32.mrf.mxu0 }
  0xdd   :  { %v395_v4 = vpop.f32.mrf.mxu1  ;;  %v399_v10 = vadd.f32 %v393_v0, %v339_v5 }
  0xde   :  { %v336_v6 = vpop.f32.mrf.mxu0 }
  0xdf   :  { %v396_v7 = vpop.f32.mrf.mxu1 }
  0xe0   :  { %v451_v9 = vpop.f32.mrf.mxu0 }
  0xe1   :  { %v458_v11 = vadd.f32 %v451_v9, %v398_v8 }
  0xe2   :  { %v453_v12 = vpop.f32.mrf.mxu0 }
  0xe3   :  { %460 = vst [vmem:[%s656_s9] sm:$0xff] %v458_v11  ;;  %v459_v13 = vadd.f32 %v453_v12, %v399_v10 }
  0xe4   :  { %v455_v14 = vpop.f32.mrf.mxu0 }
  0xe5   :  { %461 = vst [vmem:[%s656_s9 + $0x8] sm:$0xff] %v459_v13 }
  0xe6   :  { %v456_v15 = vpop.f32.mrf.mxu0 }

</bundles_post_ra>
